<compile_context>
chip_gen: v5e
topology: v5e:2x2
jax: 0.10.0
libtpu: 0.0.40
codegen_flags: <defaults>
</compile_context>

<pallas_src>
import jax
import jax.numpy as jnp
from jax.experimental import pallas as pl
from jax.experimental.pallas import tpu as pltpu


def _round_up(x, m):
    return ((x + m - 1) // m) * m


def fcn_kernel(x_ref, w_ref, b_ref, o_ref):
    # Single collapsed affine layer: bf16 operands, f32 accumulation, f32 bias.
    acc = jnp.dot(x_ref[...], w_ref[...], preferred_element_type=jnp.float32)
    o_ref[...] = (acc + b_ref[...]).astype(o_ref.dtype)


def collapse_params(params):
    """Fold fc1 -> (fc2 x20) -> fc3 into one affine map, all in f32."""
    w1, b1, w2, b2, w3, b3 = params
    hidden = w2.shape[0]

    w2_pow = jnp.eye(hidden, dtype=jnp.float32)      # W2^0
    s = jnp.zeros((hidden, hidden), dtype=jnp.float32)
    for _ in range(20):
        s = s + w2_pow                                # accumulates W2^0 .. W2^19
        w2_pow = w2_pow @ w2                          # ends as W2^20

    w_eff = w1 @ w2_pow @ w3                          # (input_dim, nb_classes)
    b_eff = (b1 @ w2_pow + b2 @ s) @ w3 + b3          # (1, nb_classes)
    return w_eff, b_eff


def fcn_forward(x, params, *, tile_n_max=2048):
    """x: any shape that flattens (PyTorch .view(-1, input_dim)) to (N, input_dim)."""
    w1 = params[0]
    w3 = params[4]
    input_dim = w1.shape[0]
    nb_classes = w3.shape[1]

    w_eff, b_eff = collapse_params(params)

    x2d = x.reshape(-1, input_dim)                    # x.view(-1, input_dim)
    n = x2d.shape[0]

    LANE = 128
    d_p = _round_up(input_dim, LANE)
    c_p = _round_up(nb_classes, LANE)

    # Zero-pad feature dims to full lanes (exact: padded rows/cols are zero).
    xp = jnp.pad(x2d, ((0, 0), (0, d_p - input_dim))).astype(jnp.bfloat16)
    wp = jnp.pad(w_eff, ((0, d_p - input_dim), (0, c_p - nb_classes))).astype(jnp.bfloat16)
    bp = jnp.pad(b_eff, ((0, 0), (0, c_p - nb_classes)))  # stays f32

    # Batch tiling: multiple of 8 sublanes; aim for >=2 grid steps so the
    # "parallel" axis shards across both v7x TensorCores when N is large
    # enough; cap per-step tile so VMEM use stays small on every generation.
    tile_n = min(tile_n_max, max(8, _round_up(pl.cdiv(n, 2), 8)))
    n_p = _round_up(max(n, 1), tile_n)
    xp = jnp.pad(xp, ((0, n_p - n), (0, 0)))

    grid = (pl.cdiv(n_p, tile_n),)

    out_p = pl.pallas_call(
        fcn_kernel,
        out_shape=jax.ShapeDtypeStruct((n_p, c_p), jnp.float32),
        grid=grid,
        in_specs=[
            pl.BlockSpec((tile_n, d_p), lambda i: (i, 0)),   # x tile (pipelined)
            pl.BlockSpec((d_p, c_p), lambda i: (0, 0)),      # W_eff (resident)
            pl.BlockSpec((1, c_p), lambda i: (0, 0)),        # b_eff (resident)
        ],
        out_specs=pl.BlockSpec((tile_n, c_p), lambda i: (i, 0)),
        compiler_params=pltpu.CompilerParams(
            dimension_semantics=("parallel",)),
    )(xp, wp, bp)

    return out_p[:n, :nb_classes]


def init_params(key, input_dim, nb_classes, hidden=50):
    """Deterministic synthetic params. Weights stored as (in, out); biases (1, out)."""
    ks = jax.random.split(key, 6)

    def linear(kw, kb, fan_in, fan_out):
        bound = 1.0 / jnp.sqrt(fan_in)
        w = jax.random.uniform(kw, (fan_in, fan_out), jnp.float32, -bound, bound)
        b = jax.random.uniform(kb, (1, fan_out), jnp.float32, -bound, bound)
        return w, b

    w1, b1 = linear(ks[0], ks[1], input_dim, hidden)
    w2, b2 = linear(ks[2], ks[3], hidden, hidden)
    w3, b3 = linear(ks[4], ks[5], hidden, nb_classes)
    return (w1, b1, w2, b2, w3, b3)


def fcn_reference(x, params):
    """Pure-JAX f32 reference matching the PyTorch forward step by step."""
    w1, b1, w2, b2, w3, b3 = params
    h = x.reshape(-1, w1.shape[0]) @ w1 + b1
    for _ in range(20):
        h = h @ w2 + b2
    return h @ w3 + b3


if __name__ == "__main__":
    input_dim = 256            # matches x.view(-1, 256) for a (2, 4, 16, 16) input
    nb_classes = 10

    key = jax.random.PRNGKey(0)
    k_x, k_p = jax.random.split(key)

    # (2, 4, 16, 16) has 2048 elements -> view(-1, 256) gives (8, 256) rows.
    x = jax.random.normal(k_x, (2, 4, 16, 16), dtype=jnp.float32)
    params = init_params(k_p, input_dim, nb_classes)

    out = fcn_forward(x, params)
    jax.block_until_ready(out)

    ref = fcn_reference(x, params)
    assert out.shape == (8, nb_classes), out.shape
    # bf16 MXU operands (x, W_eff) with f32 accumulation -> slightly loose tol.
    assert jnp.allclose(out, ref, atol=2e-2, rtol=2e-2), float(
        jnp.max(jnp.abs(out - ref)))

    print("KERNEL_OK")
</pallas_src>

<mosaic_0001>
module attributes {stable_mosaic.version = 11 : i64} {
  func.func @fcn_kernel(%arg0: i32, %arg1: memref<8x256xbf16, #tpu.memory_space<vmem>>, %arg2: memref<256x128xbf16, #tpu.memory_space<vmem>>, %arg3: memref<1x128xf32, #tpu.memory_space<vmem>>, %arg4: memref<8x128xf32, #tpu.memory_space<vmem>>) attributes {dimension_semantics = [#tpu.dimension_semantics<parallel>], iteration_bounds = array<i64: 1>, scalar_prefetch = 0 : i64, scratch_operands = 0 : i64, tpu.core_type = #tpu.core_type<tc>, window_params = [{transform_indices = @transform_0, window_bounds = array<i64: 8, 256>}, {pipeline_mode = #tpu.pipeline_mode<synchronous>, transform_indices = @transform_1, window_bounds = array<i64: 256, 128>}, {pipeline_mode = #tpu.pipeline_mode<synchronous>, transform_indices = @transform_2, window_bounds = array<i64: 1, 128>}, {transform_indices = @transform_3, window_bounds = array<i64: 8, 128>}]} {
    %c0 = arith.constant 0 : index
    %c0_0 = arith.constant 0 : index
    %0 = vector.load %arg1[%c0, %c0_0] : memref<8x256xbf16, #tpu.memory_space<vmem>>, vector<8x256xbf16>
    %c0_1 = arith.constant 0 : index
    %c0_2 = arith.constant 0 : index
    %1 = vector.load %arg2[%c0_1, %c0_2] : memref<256x128xbf16, #tpu.memory_space<vmem>>, vector<256x128xbf16>
    %cst = arith.constant dense<0.000000e+00> : vector<8x128xf32>
    %2 = tpu.matmul %0, %1, %cst {dimension_numbers = #tpu.dot_dimension_numbers<[1], [0], [0], [1], [0, 0, 1, 1], [], []>} : vector<8x256xbf16>, vector<256x128xbf16>, vector<8x128xf32> -> vector<8x128xf32>
    %c0_3 = arith.constant 0 : index
    %c0_4 = arith.constant 0 : index
    %3 = vector.load %arg3[%c0_3, %c0_4] : memref<1x128xf32, #tpu.memory_space<vmem>>, vector<1x128xf32>
    %4 = vector.broadcast %3 : vector<1x128xf32> to vector<8x128xf32>
    %5 = arith.addf %2, %4 : vector<8x128xf32>
    %c0_5 = arith.constant 0 : index
    %c0_6 = arith.constant 0 : index
    %6 = vector.load %arg4[%c0_5, %c0_6] : memref<8x128xf32, #tpu.memory_space<vmem>>, vector<8x128xf32>
    tpu.vector_store %arg4[%c0_5, %c0_6], %5 {strides = array<i32>} : memref<8x128xf32, #tpu.memory_space<vmem>>, vector<8x128xf32>,
    return
  }
  func.func @transform_0(%arg0: i32) -> (i32, i32) {
    %c0_i32 = arith.constant 0 : i32
    %c0_i32_0 = arith.constant 0 : i32
    return %arg0, %c0_i32 : i32, i32
  }
  func.func @transform_1(%arg0: i32) -> (i32, i32) {
    %c0_i32 = arith.constant 0 : i32
    %c0_i32_0 = arith.constant 0 : i32
    %c0_i32_1 = arith.constant 0 : i32
    return %c0_i32, %c0_i32_0 : i32, i32
  }
  func.func @transform_2(%arg0: i32) -> (i32, i32) {
    %c0_i32 = arith.constant 0 : i32
    %c0_i32_0 = arith.constant 0 : i32
    %c0_i32_1 = arith.constant 0 : i32
    return %c0_i32, %c0_i32_0 : i32, i32
  }
  func.func @transform_3(%arg0: i32) -> (i32, i32) {
    %c0_i32 = arith.constant 0 : i32
    %c0_i32_0 = arith.constant 0 : i32
    return %arg0, %c0_i32 : i32, i32
  }
}

</mosaic_0001>

<bundles_post_ra>
// kernel: tpu_custom_call.1
= control target key start
LH: loop header
LB: loop body
LE: loop exit
PB: predicated region body
PF: predicated region fallthrough
CT: control target
= control target key end

     0   :  { %8 = vsyncpa [#allocation3], 0  ;;  %s431_s0 = inlined_call_operand.hbm [shape: bf16[8,256], index: 0, kind: input, shape index: {}]   ;;  %s432_s1 = inlined_call_operand.hbm [shape: bf16[256,128], index: 1, kind: input, shape index: {}]   ;;  %s433_s2 = inlined_call_operand.vmem [shape: f32[1,128], index: 2, kind: input, shape index: {}]   ;;  %s434_s3 = inlined_call_operand.hbm [shape: f32[8,128], index: 3, kind: output, shape index: {}]  }
   0x1   :  { %9 = vsyncpa [#allocation6], 0 }
   0x2   :  { %10 = vsyncpa [#allocation4], 0  ;;  %s16_s14 = sshll.u32 %s431_s0, 4  ;;  %s394_s15 = smov [#allocation2]   ;;  %s17_s14 = int_to_ptr.hbm [resolvable:$true] %s16_s14 }
   0x3   :  { %s18_s16 = sshll.u32 %s394_s15, 4  ;;  %s26_s19 = sshll.u32 %s432_s1, 4  ;;  %s19_s16 = int_to_ptr.vmem [resolvable:$true] %s18_s16  ;;  %s27_s19 = int_to_ptr.hbm [resolvable:$true] %s26_s19 }
   0x4   :  { %21 = dma.hbm_to_vmem [thread:$0]  %s17_s14, 128, %s19_s16, [#allocation3]  }
   0x5   :  { %s395_s20 = smov [#allocation5]   ;;  %s396_s22 = smov 64  }
   0x6   :  { %s28_s21 = sshll.u32 %s395_s20, 4  ;;  %s397_s23 = smov 4   ;;  %s29_s21 = int_to_ptr.vmem [resolvable:$true] %s28_s21 }
   0x7   :  { %34 = dma.hbm_to_vmem [thread:$0]  %s27_s19, 2048, %s29_s21, [#allocation6], %s396_s22, %s396_s22, %s397_s23  }
   0x8   :  { %388 = dma.done.wait [#allocation3], 128  }
   0x9   :  { %389 = vsyncadd [#allocation3], 4294967168 }
   0xa   :  { %390 = dma.done.wait [#allocation6], 2048  }
   0xb   :  { %391 = vsyncadd [#allocation6], 4294965248  ;;  %v301_v0 = vld [vmem:[#allocation5 + $0x38] sm:$0xff]  ;;  %v300_v2 = vld [vmem:[#allocation5 + $0x30] sm:$0xff]  ;;  %s398_s24 = smov [#allocation7]   ;;  %s219_s28 = sshll.u32 %s434_s3, 4  ;;  %s220_s28 = int_to_ptr.hbm [resolvable:$true] %s219_s28 }
   0xc   :  { %v309_v1 = vld [vmem:[#allocation5 + $0x78] sm:$0xff]  ;;  %185 = vmatpush.bf16.msra.mxu0 %v301_v0  ;;  %v308_v3 = vld [vmem:[#allocation5 + $0x70] sm:$0xff]  ;;  %v299_v4 = vld [vmem:[#allocation5 + $0x28] sm:$0xff]  ;;  %s217_s25 = sshll.u32 %s398_s24, 4  ;;  %s218_s25 = int_to_ptr.vmem [resolvable:$true] %s217_s25 }
   0xd   :  { %198 = vmatpush.bf16.msra.mxu1 %v309_v1  ;;  %v307_v5 = vld [vmem:[#allocation5 + $0x68] sm:$0xff]  ;;  %v298_v6 = vld [vmem:[#allocation5 + $0x20] sm:$0xff]  ;;  %v297_v8 = vld [vmem:[#allocation5 + $0x18] sm:$0xff] }
   0xe   :  { %v306_v7 = vld [vmem:[#allocation5 + $0x60] sm:$0xff]  ;;  %v305_v9 = vld [vmem:[#allocation5 + $0x58] sm:$0xff]  ;;  %v296_v10 = vld [vmem:[#allocation5 + $0x10] sm:$0xff] }
   0xf   :  { %v304_v11 = vld [vmem:[#allocation5 + $0x50] sm:$0xff]  ;;  %v295_v12 = vld [vmem:[#allocation5 + $0x8] sm:$0xff]  ;;  %v45_v14 = vld [vmem:[#allocation2] sm:$0xff] }
  0x10   :  { %186 = vmatpush.bf16.msra.mxu0 %v300_v2  ;;  %v303_v13 = vld [vmem:[#allocation5 + $0x48] sm:$0xff]  ;;  %v83_v15 = vunpack.c.l.b16 %v45_v14  ;;  %v84_v16 = vunpack.c.h.b16 %v45_v14  ;;  %v294_v17 = vld [vmem:[#allocation5] sm:$0xff]  ;;  %v315_v21 = vld [vmem:[%s433_s2] ss:$0 sm:$0xff] }
  0x11   :  { %199 = vmatpush.bf16.msra.mxu1 %v308_v3  ;;  %v302_v18 = vld [vmem:[#allocation5 + $0x40] sm:$0xff] }
  0x12   :  { %v85_v19 = vpack.c.b16 %v83_v15, %v83_v15  ;;  %v86_v20 = vpack.c.b16 %v84_v16, %v84_v16 }
  0x14   :  { %187 = vmatpush.bf16.msra.mxu0 %v299_v4 }
  0x15   :  { %200 = vmatpush.bf16.msra.mxu1 %v307_v5 }
  0x18   :  { %188 = vmatpush.bf16.msra.mxu0 %v298_v6 }
  0x19   :  { %201 = vmatpush.bf16.msra.mxu1 %v306_v7 }
  0x1c   :  { %189 = vmatpush.bf16.msra.mxu0 %v297_v8 }
  0x1d   :  { %202 = vmatpush.bf16.msra.mxu1 %v305_v9 }
  0x20   :  { %190 = vmatpush.bf16.msra.mxu0 %v296_v10 }
  0x21   :  { %203 = vmatpush.bf16.msra.mxu1 %v304_v11 }
  0x24   :  { %191 = vmatpush.bf16.msra.mxu0 %v295_v12 }
  0x25   :  { %204 = vmatpush.bf16.msra.mxu1 %v303_v13 }
  0x28   :  { %192 = vmatpush.bf16.msra.mxu0 %v294_v17 }
  0x29   :  { %205 = vmatpush.bf16.msra.mxu1 %v302_v18 }
  0x2b   :  { %193 = vmatmul.bf16.vlgmr.msra.gmra.mxu0 %v85_v19 }
  0x2c   :  { %206 = vmatmul.bf16.vlgmr.msra.gmra.mxu1 %v86_v20 }
  0xa8   :  { %v194_v22 = vpop.f32.mrf.mxu0 }
  0xa9   :  { %v207_v23 = vpop.f32.mrf.mxu1  ;;  %v195_v24 = vadd.f32 %v315_v21, %v194_v22 }
  0xab   :  { %v208_v25 = vadd.f32 %v207_v23, %v195_v24 }
  0xad   :  { %211 = vst [vmem:[#allocation7] sm:$0xff] %v208_v25 }
  0xae   :  { %222 = dma.vmem_to_hbm [thread:$0]  %s218_s25, 128, %s220_s28, [#allocation4]  }
  0xb0   :  { %v196_v26 = vpop.f32.mrf.mxu0 }
  0xb1   :  { %v209_v27 = vpop.f32.mrf.mxu1 }
  0xb2   :  { %392 = dma.done.wait [#allocation4], 128  }
  0xb3   :  { %393 = vsyncadd [#allocation4], 4294967168 }
  0xb4   :  { %227 = vsyncpa [#allocation3], 1 }
  0xb5   :  { %228 = vsyncpa [#allocation6], 1 }
  0xb6   :  { %229 = vsyncpa [#allocation4], 1 }

</bundles_post_ra>
